<compile_context>
chip_gen: v5e
topology: v5e:2x2
jax: 0.10.0
libtpu: 0.0.40
codegen_flags: <defaults>
</compile_context>

<pallas_src>
import jax
import jax.numpy as jnp
from jax.experimental import pallas as pl
from jax.experimental.pallas import tpu as pltpu


_TARGET_BLOCK_ELEMS = 1024 * 1024        # ~4 MiB of f32 per q/k block
_VMEM_LIMIT_BYTES = 52 * 1024 * 1024     # worst case usage ~48 MiB; fits v7x 64 MiB


def _choose_blocks(BH: int, R: int, W: int, itemsize: int):
    """Pick (bh_blk, row_blk).

    Targets ~4 MiB per input block; row block is a multiple of the packed-dtype
    sublane tile (8 f32 / 16 bf16 / 32 int8) or the full dim; bh block is a
    divisor of BH.  If everything fits in one block, split anyway so the grid
    has >= 2 steps on a 'parallel' axis (v7x has two TensorCores to feed).
    """
    row_quant = 8 * max(1, 4 // max(1, itemsize))
    if R * W <= _TARGET_BLOCK_ELEMS:
        row_blk = R
    else:
        row_blk = max(row_quant, ((_TARGET_BLOCK_ELEMS // W) // row_quant) * row_quant)
        row_blk = min(row_blk, R)
    max_bh = min(BH, max(1, _TARGET_BLOCK_ELEMS // (row_blk * W)))
    bh_blk = 1
    for d in range(max_bh, 0, -1):
        if BH % d == 0:
            bh_blk = d
            break
    # Avoid a degenerate (1, 1) grid: split bh (or rows) so megacore parts can
    # shard the 'parallel' axes across TensorCores.
    if bh_blk == BH and row_blk >= R:
        if BH > 1:
            for d in range(BH // 2, 0, -1):
                if BH % d == 0:
                    bh_blk = d
                    break
        elif R > row_quant:
            half = -(-R // 2)
            row_blk = max(row_quant, (half // row_quant) * row_quant)
    return bh_blk, row_blk


def _apply_rope(xs, cos_t, sin_e_t):
    """Apply RoPE to every (B, H, L, D) array in `xs` (identical shapes) with a
    single fused pallas_call.

    cos_t / sin_e_t are (L, D) float32: the interleave-expanded cos table and
    the even-lane, sign-folded sin table (-sin on even lanes, 0 on odd lanes).
    The odd-lane table is derived inside the kernel as  s_o = -roll(s_e, +1).
    """
    n = len(xs)
    B, H, L, D = xs[0].shape
    BH = B * H
    if D % 2 != 0:
        raise ValueError("rotary dim must be even")

    # Lane-dense layout: flatten (L, D) and zero-pad to a multiple of 128 so all
    # stores are full, unmasked 128-lane vector stores for any D / L.
    # Pairs (2j, 2j+1) never straddle a 128-lane row because 2j+1 is odd; padded
    # lanes hit zero table entries, produce zeros, and are sliced off afterwards.
    flat = L * D
    W = 128
    P = -(-flat // W) * W
    R = P // W

    def pad_rows(a2):                        # (rows, flat) -> (rows, P)
        return a2 if P == flat else jnp.pad(a2, ((0, 0), (0, P - flat)))

    xr = [pad_rows(x.reshape(BH, flat)).reshape(BH, R, W) for x in xs]
    ct = pad_rows(cos_t.reshape(1, flat)).reshape(R, W)
    se = pad_rows(sin_e_t.reshape(1, flat)).reshape(R, W)

    bh_blk, row_blk = _choose_blocks(BH, R, W, jnp.dtype(xs[0].dtype).itemsize)
    # Rows outermost: the table block index is constant across the inner bh axis,
    # so each cos/sin block is fetched from HBM only once per row block.
    grid = (pl.cdiv(R, row_blk), pl.cdiv(BH, bh_blk))

    x_spec = pl.BlockSpec((bh_blk, row_blk, W), lambda r, b: (b, r, 0))
    t_spec = pl.BlockSpec((row_blk, W), lambda r, b: (r, 0))

    def kernel(*refs):
        in_refs = refs[:n]
        c_ref, se_ref = refs[n], refs[n + 1]
        out_refs = refs[n + 2:]
        c = c_ref[...]                                   # (row_blk, W) f32
        s_e = se_ref[...]                                # -sin on even lanes, 0 on odd
        # Odd-lane +sin table, derived once per grid step (wrap lane lands on a
        # zero entry, so the in-row rotation is exact).
        s_o = -pltpu.roll(s_e, shift=1, axis=1)
        for x_ref, o_ref in zip(in_refs, out_refs):
            @pl.loop(0, bh_blk)
            def _(i, x_ref=x_ref, o_ref=o_ref):
                x = x_ref[i].astype(jnp.float32)         # (row_blk, W)
                # Pair swap via lane rotations (XLU slot): fwd[d]=x[d+1],
                # bwd[d]=x[d-1]; wrap elements hit the zero lanes of s_e/s_o.
                fwd = pltpu.roll(x, shift=W - 1, axis=1)
                bwd = pltpu.roll(x, shift=1, axis=1)
                o_ref[i] = (x * c + fwd * s_e + bwd * s_o).astype(o_ref.dtype)

    outs = pl.pallas_call(
        kernel,
        out_shape=tuple(jax.ShapeDtypeStruct((BH, R, W), x.dtype) for x in xs),
        grid_spec=pltpu.PrefetchScalarGridSpec(
            num_scalar_prefetch=0,
            grid=grid,
            in_specs=[x_spec] * n + [t_spec] * 2,
            out_specs=tuple(x_spec for _ in xs),
        ),
        compiler_params=pltpu.CompilerParams(
            dimension_semantics=("parallel", "parallel"),
            vmem_limit_bytes=_VMEM_LIMIT_BYTES,
        ),
    )(*xr, ct, se)
    if not isinstance(outs, (tuple, list)):
        outs = (outs,)

    def unpack(o):
        o = o.reshape(BH, P)
        if P != flat:
            o = o[:, :flat]
        return o.reshape(B, H, L, D)

    return tuple(unpack(o) for o in outs)


def generate_rotary_tables(max_seqlen: int, dim: int, theta: float = 10000.0,
                           scale: float = 1.0):
    """Deterministic 'parameters' (matches generate_rotary_embedding), stored as
    the interleave-expanded cos table and the even-lane, sign-folded sin table."""
    av = theta ** (-(jnp.arange(0, dim, 2, dtype=jnp.float32) / dim)) / scale
    angles = jnp.arange(max_seqlen, dtype=jnp.float32)[:, None] * av[None, :]
    cos = jnp.cos(angles)                          # (S, dim//2)
    sin = jnp.sin(angles)                          # (S, dim//2)
    cos_full = jnp.repeat(cos, 2, axis=-1)         # [c0,c0,c1,c1,...]
    sin_full = jnp.repeat(sin, 2, axis=-1)         # [s0,s0,s1,s1,...]
    d = jnp.arange(dim)
    sin_e = jnp.where(d % 2 == 0, -sin_full, 0.0).astype(jnp.float32)  # even: -s
    return cos_full.astype(jnp.float32), sin_e


class RotaryEmbedding:
    """JAX/Pallas port of the PyTorch RotaryEmbedding module (forward only)."""

    def __init__(self, max_sequence_length: int, dim: int, seq_dim: int = -2,
                 theta: float = 10000.0):
        self.max_sequence_length = int(max_sequence_length)
        self.dim = int(dim)
        self.seq_dim = seq_dim
        if self.max_sequence_length > 0:
            self.cos_full, self.sin_e = generate_rotary_tables(
                self.max_sequence_length, self.dim, theta)

    def _tables_for(self, L: int):
        if L > self.max_sequence_length:
            raise ValueError("sequence length exceeds max_sequence_length")
        start = self.max_sequence_length - L        # angles[-L:]
        return self.cos_full[start:], self.sin_e[start:]

    def _check_layout(self, x):
        sd = self.seq_dim if self.seq_dim >= 0 else self.seq_dim + x.ndim
        if sd != x.ndim - 2:
            raise ValueError("Pallas RotaryEmbedding assumes the sequence axis is -2")
        if x.shape[-1] != self.dim:
            raise ValueError("last dim of input must equal the rotary dim")

    @staticmethod
    def _to_4d(x):
        # torch broadcasting vs. (1,1,L,dim//2) angles adds a leading 1-dim to the
        # 3-D input's output; reproduce that exactly by promoting to 4-D.
        return x[None] if x.ndim == 3 else x

    def __call__(self, q, k):
        if self.max_sequence_length == 0:
            return q, k
        self._check_layout(q)
        self._check_layout(k)
        q4, k4 = self._to_4d(q), self._to_4d(k)
        if q4.shape == k4.shape:
            cos, se = self._tables_for(q4.shape[-2])
            q_out, k_out = _apply_rope((q4, k4), cos, se)
        else:
            (q_out,) = _apply_rope((q4,), *self._tables_for(q4.shape[-2]))
            (k_out,) = _apply_rope((k4,), *self._tables_for(k4.shape[-2]))
        return q_out, k_out


def _reference_rope(x, max_seqlen, dim, theta=10000.0):
    """Pure-JAX reference mirroring apply_rotary_embedding (4-D path)."""
    av = theta ** (-(jnp.arange(0, dim, 2, dtype=jnp.float32) / dim))
    angles = jnp.arange(max_seqlen, dtype=jnp.float32)[:, None] * av[None, :]
    L = x.shape[-2]
    ang = angles[max_seqlen - L:]                 # (L, dim//2)
    c, s = jnp.cos(ang), jnp.sin(ang)
    xf = x.astype(jnp.float32).reshape(*x.shape[:-1], dim // 2, 2)
    xr, xi = xf[..., 0], xf[..., 1]
    orr = xr * c - xi * s
    oii = xr * s + xi * c
    out = jnp.stack([orr, oii], axis=-1).reshape(x.shape)
    return out.astype(x.dtype)


if __name__ == "__main__":
    key = jax.random.PRNGKey(0)
    kq, kk, kq2, kk2 = jax.random.split(key, 4)
    MAX_SEQ = 16

    # Test 1: L*D multiple of 128 (lane-dense without padding).
    B, H, L, D = 2, 4, 8, 32
    q = jax.random.normal(kq, (B, H, L, D), dtype=jnp.float32)
    k = jax.random.normal(kk, (B, H, L, D), dtype=jnp.float32)
    rope = RotaryEmbedding(max_sequence_length=MAX_SEQ, dim=D)
    q_out, k_out = rope(q, k)
    q_out = jax.block_until_ready(q_out)
    k_out = jax.block_until_ready(k_out)
    q_ref = _reference_rope(q, MAX_SEQ, D)
    k_ref = _reference_rope(k, MAX_SEQ, D)
    assert q_out.shape == q.shape and q_out.dtype == q.dtype
    assert k_out.shape == k.shape and k_out.dtype == k.dtype
    assert jnp.allclose(q_out, q_ref, atol=1e-4, rtol=1e-4)
    assert jnp.allclose(k_out, k_ref, atol=1e-4, rtol=1e-4)

    # Test 2: L*D NOT a multiple of 128 -> exercises the zero-pad lane-dense path.
    B2, H2, L2, D2 = 2, 4, 6, 48      # L*D = 288 -> padded to 384
    q2 = jax.random.normal(kq2, (B2, H2, L2, D2), dtype=jnp.float32)
    k2 = jax.random.normal(kk2, (B2, H2, L2, D2), dtype=jnp.float32)
    rope2 = RotaryEmbedding(max_sequence_length=MAX_SEQ, dim=D2)
    q2_out, k2_out = rope2(q2, k2)
    q2_out = jax.block_until_ready(q2_out)
    k2_out = jax.block_until_ready(k2_out)
    assert jnp.allclose(q2_out, _reference_rope(q2, MAX_SEQ, D2), atol=1e-4, rtol=1e-4)
    assert jnp.allclose(k2_out, _reference_rope(k2, MAX_SEQ, D2), atol=1e-4, rtol=1e-4)

    print("KERNEL_OK")
</pallas_src>

<mosaic_0001>
module attributes {stable_mosaic.version = 11 : i64} {
  func.func @kernel(%arg0: i32, %arg1: i32, %arg2: memref<4x2x128xf32, #tpu.memory_space<vmem>>, %arg3: memref<4x2x128xf32, #tpu.memory_space<vmem>>, %arg4: memref<2x128xf32, #tpu.memory_space<vmem>>, %arg5: memref<2x128xf32, #tpu.memory_space<vmem>>, %arg6: memref<4x2x128xf32, #tpu.memory_space<vmem>>, %arg7: memref<4x2x128xf32, #tpu.memory_space<vmem>>) attributes {dimension_semantics = [#tpu.dimension_semantics<parallel>, #tpu.dimension_semantics<parallel>], iteration_bounds = array<i64: 1, 2>, scalar_prefetch = 0 : i64, scratch_operands = 0 : i64, tpu.core_type = #tpu.core_type<tc>, window_params = [{transform_indices = @transform_0, window_bounds = array<i64: 4, 2, 128>}, {transform_indices = @transform_1, window_bounds = array<i64: 4, 2, 128>}, {transform_indices = @transform_2, window_bounds = array<i64: 2, 128>}, {transform_indices = @transform_3, window_bounds = array<i64: 2, 128>}, {transform_indices = @transform_4, window_bounds = array<i64: 4, 2, 128>}, {transform_indices = @transform_5, window_bounds = array<i64: 4, 2, 128>}]} {
    %c0 = arith.constant 0 : index
    %c0_0 = arith.constant 0 : index
    %0 = vector.load %arg4[%c0, %c0_0] : memref<2x128xf32, #tpu.memory_space<vmem>>, vector<2x128xf32>
    %c0_1 = arith.constant 0 : index
    %c0_2 = arith.constant 0 : index
    %1 = vector.load %arg5[%c0_1, %c0_2] : memref<2x128xf32, #tpu.memory_space<vmem>>, vector<2x128xf32>
    %c1_i32 = arith.constant 1 : i32
    %2 = tpu.dynamic_rotate %1 by %c1_i32 dim 1 : vector<2x128xf32>, i32 -> vector<2x128xf32>
    %cst = arith.constant 0.000000e+00 : f32
    %3 = vector.broadcast %cst : f32 to vector<2x128xf32>
    %4 = arith.subf %3, %2 : vector<2x128xf32>
    %c0_i32 = arith.constant 0 : i32
    %c4_i32 = arith.constant 4 : i32
    %5 = arith.addi %c0_i32, %c4_i32 : i32
    %c1_i32_3 = arith.constant 1 : i32
    scf.for %arg8 = %c0_i32 to %5 step %c1_i32_3  : i32 {
      %c1_i32_9 = arith.constant 1 : i32
      %7 = arith.muli %arg8, %c1_i32_9 : i32
      %c0_i32_10 = arith.constant 0 : i32
      %8 = arith.addi %c0_i32_10, %7 : i32
      %9 = arith.index_cast %8 : i32 to index
      %c0_11 = arith.constant 0 : index
      %c0_12 = arith.constant 0 : index
      %10 = vector.load %arg2[%9, %c0_11, %c0_12] : memref<4x2x128xf32, #tpu.memory_space<vmem>>, vector<1x2x128xf32>
      %11 = vector.shape_cast %10 : vector<1x2x128xf32> to vector<2x128xf32>
      %c127_i32 = arith.constant 127 : i32
      %12 = tpu.dynamic_rotate %11 by %c127_i32 dim 1 : vector<2x128xf32>, i32 -> vector<2x128xf32>
      %c1_i32_13 = arith.constant 1 : i32
      %13 = tpu.dynamic_rotate %11 by %c1_i32_13 dim 1 : vector<2x128xf32>, i32 -> vector<2x128xf32>
      %14 = arith.mulf %11, %0 : vector<2x128xf32>
      %15 = arith.mulf %12, %1 : vector<2x128xf32>
      %16 = arith.addf %14, %15 : vector<2x128xf32>
      %17 = arith.mulf %13, %4 : vector<2x128xf32>
      %18 = arith.addf %16, %17 : vector<2x128xf32>
      %19 = arith.index_cast %8 : i32 to index
      %c0_14 = arith.constant 0 : index
      %c0_15 = arith.constant 0 : index
      %20 = vector.load %arg6[%19, %c0_14, %c0_15] : memref<4x2x128xf32, #tpu.memory_space<vmem>>, vector<1x2x128xf32>
      %21 = vector.shape_cast %20 : vector<1x2x128xf32> to vector<2x128xf32>
      %22 = vector.shape_cast %18 : vector<2x128xf32> to vector<1x2x128xf32>
      tpu.vector_store %arg6[%19, %c0_14, %c0_15], %22 {strides = array<i32>} : memref<4x2x128xf32, #tpu.memory_space<vmem>>, vector<1x2x128xf32>,
    }
    %c4_i32_4 = arith.constant 4 : i32
    %c0_i32_5 = arith.constant 0 : i32
    %c4_i32_6 = arith.constant 4 : i32
    %6 = arith.addi %c0_i32_5, %c4_i32_6 : i32
    %c1_i32_7 = arith.constant 1 : i32
    scf.for %arg8 = %c0_i32_5 to %6 step %c1_i32_7  : i32 {
      %c1_i32_9 = arith.constant 1 : i32
      %7 = arith.muli %arg8, %c1_i32_9 : i32
      %c0_i32_10 = arith.constant 0 : i32
      %8 = arith.addi %c0_i32_10, %7 : i32
      %9 = arith.index_cast %8 : i32 to index
      %c0_11 = arith.constant 0 : index
      %c0_12 = arith.constant 0 : index
      %10 = vector.load %arg3[%9, %c0_11, %c0_12] : memref<4x2x128xf32, #tpu.memory_space<vmem>>, vector<1x2x128xf32>
      %11 = vector.shape_cast %10 : vector<1x2x128xf32> to vector<2x128xf32>
      %c127_i32 = arith.constant 127 : i32
      %12 = tpu.dynamic_rotate %11 by %c127_i32 dim 1 : vector<2x128xf32>, i32 -> vector<2x128xf32>
      %c1_i32_13 = arith.constant 1 : i32
      %13 = tpu.dynamic_rotate %11 by %c1_i32_13 dim 1 : vector<2x128xf32>, i32 -> vector<2x128xf32>
      %14 = arith.mulf %11, %0 : vector<2x128xf32>
      %15 = arith.mulf %12, %1 : vector<2x128xf32>
      %16 = arith.addf %14, %15 : vector<2x128xf32>
      %17 = arith.mulf %13, %4 : vector<2x128xf32>
      %18 = arith.addf %16, %17 : vector<2x128xf32>
      %19 = arith.index_cast %8 : i32 to index
      %c0_14 = arith.constant 0 : index
      %c0_15 = arith.constant 0 : index
      %20 = vector.load %arg7[%19, %c0_14, %c0_15] : memref<4x2x128xf32, #tpu.memory_space<vmem>>, vector<1x2x128xf32>
      %21 = vector.shape_cast %20 : vector<1x2x128xf32> to vector<2x128xf32>
      %22 = vector.shape_cast %18 : vector<2x128xf32> to vector<1x2x128xf32>
      tpu.vector_store %arg7[%19, %c0_14, %c0_15], %22 {strides = array<i32>} : memref<4x2x128xf32, #tpu.memory_space<vmem>>, vector<1x2x128xf32>,
    }
    %c4_i32_8 = arith.constant 4 : i32
    return
  }
  func.func @transform_0(%arg0: i32, %arg1: i32) -> (i32, i32, i32) {
    %c0_i32 = arith.constant 0 : i32
    %c0_i32_0 = arith.constant 0 : i32
    return %arg1, %arg0, %c0_i32 : i32, i32, i32
  }
  func.func @transform_1(%arg0: i32, %arg1: i32) -> (i32, i32, i32) {
    %c0_i32 = arith.constant 0 : i32
    %c0_i32_0 = arith.constant 0 : i32
    return %arg1, %arg0, %c0_i32 : i32, i32, i32
  }
  func.func @transform_2(%arg0: i32, %arg1: i32) -> (i32, i32) {
    %c0_i32 = arith.constant 0 : i32
    %c0_i32_0 = arith.constant 0 : i32
    return %arg0, %c0_i32 : i32, i32
  }
  func.func @transform_3(%arg0: i32, %arg1: i32) -> (i32, i32) {
    %c0_i32 = arith.constant 0 : i32
    %c0_i32_0 = arith.constant 0 : i32
    return %arg0, %c0_i32 : i32, i32
  }
  func.func @transform_4(%arg0: i32, %arg1: i32) -> (i32, i32, i32) {
    %c0_i32 = arith.constant 0 : i32
    %c0_i32_0 = arith.constant 0 : i32
    return %arg1, %arg0, %c0_i32 : i32, i32, i32
  }
  func.func @transform_5(%arg0: i32, %arg1: i32) -> (i32, i32, i32) {
    %c0_i32 = arith.constant 0 : i32
    %c0_i32_0 = arith.constant 0 : i32
    return %arg1, %arg0, %c0_i32 : i32, i32, i32
  }
}

</mosaic_0001>

<bundles_post_ra>
// kernel: tpu_custom_call.1
= control target key start
LH: loop header
LB: loop body
LE: loop exit
PB: predicated region body
PF: predicated region fallthrough
CT: control target
= control target key end

     0   :  { %s1243_s0 = inlined_call_operand.hbm [shape: f32[8,2,128], index: 0, kind: input, shape index: {}]   ;;  %s1244_s1 = inlined_call_operand.hbm [shape: f32[8,2,128], index: 1, kind: input, shape index: {}]   ;;  %s1245_s2 = inlined_call_operand.hbm [shape: f32[2,128], index: 2, kind: input, shape index: {}]   ;;  %s1246_s3 = inlined_call_operand.vmem [shape: f32[2,128], index: 3, kind: input, shape index: {}]   ;;  %s1247_s4 = inlined_call_operand.hbm [shape: f32[8,2,128], index: 4, kind: output, shape index: {0}]   ;;  %s1248_s5 = inlined_call_operand.hbm [shape: f32[8,2,128], index: 5, kind: output, shape index: {1}]  }
   0x1   :  { %1253 = sst [smem:[#allocation20_spill]] %s1243_s0 }
   0x2   :  { %1254 = sst [smem:[#allocation21_spill]] %s1245_s2 }
   0x3   :  { %11 = vsyncpa [#allocation3], 0 }
   0x4   :  { %13 = vsyncpa [#allocation3 + $0x1], 0 }
   0x5   :  { %14 = vsyncpa [#allocation6], 0 }
   0x6   :  { %16 = vsyncpa [#allocation6 + $0x1], 0 }
   0x7   :  { %17 = vsyncpa [#allocation4], 0 }
   0x8   :  { %19 = vsyncpa [#allocation4 + $0x1], 0 }
   0x9   :  { %20 = vsyncpa [#allocation10], 0 }
   0xa   :  { %22 = vsyncpa [#allocation10 + $0x1], 0  ;;  %s1046_s18 = smov 0   ;;  %s1048_s19 = smov 0  }
   0xb   :  { %s1050_s20 = smov 0   ;;  %s1052_s21 = smov 0  }
   0xc   :  { %s1054_s22 = smov 0   ;;  %s1056_s23 = smov 0  }
   0xd LB: > { %1255 = sst [smem:[#allocation16_spill]] %s976_s18  ;;  %s1077_s24 = sadd.s32 4294967295, %s996_s23   ;;  %s996_s23 = sphi %s1056_s23, %s28_s23   ;;  %s992_s22 = sphi %s1054_s22, %s1270_s22   ;;  %s988_s21 = sphi %s1052_s21, %s1269_s21   ;;  %s984_s20 = sphi %s1050_s20, %s1273_s20   ;;  %s980_s19 = sphi %s1048_s19, %s1272_s19   ;;  %s976_s18 = sphi %s1046_s18, %s1271_s18  }
   0xe   : > { %1256 = sst [smem:[#allocation17_spill]] %s992_s22  ;;  %s637_s25 = sadd.s32 4294967294, %s996_s23  }
   0xf   : > { %s49_s26 = sadd.s32 1, %s984_s20  ;;  %p56_p0 = scmp.ne.s32.totalorder %s984_s20, %s980_s19 }
  0x10   : > { %p57_p1 = scmp.eq.s32.totalorder %s996_s23, 0  ;;  %p62_p2 = scmp.ne.s32.totalorder %s980_s19, %s976_s18 }
  0x11   : > { %p63_p3 = scmp.eq.s32.totalorder %s1077_s24, 0  ;;  %p168_p4 = scmp.eq.s32.totalorder %s1077_s24, 1 }
  0x12   : > { %p1088_p5 = por %p57_p1, %p56_p0  ;;  %p174_p6 = scmp.eq.s32.totalorder %s637_s25, 1 }
  0x13   : > { %p1094_p7 = por %p63_p3, %p62_p2  ;;  %p1098_p8 = por %p168_p4, %p56_p0 }
  0x14   : > { %p1102_p9 = por %p174_p6, %p62_p2  ;;  %p638_p10 = scmp.ge.s32.totalorder %s996_s23, 1 }
  0x15   : > { %p209_p11 = scmp.lt.s32.totalorder %s996_s23, 3  ;;  %s1262_s2 = sld [smem:[#allocation21_spill]] }
  0x16   : > { %s1260_s30 = scalar_select %p1102_p9, 1, 0 }
  0x17   : > { %p1111_p12 = pnand %p638_p10, %p209_p11  ;;  %s1006_s10 = smov [#allocation7]  }
  0x18   : > { %1261 = sst [smem:[#allocation18_spill]] %s1260_s30  ;;  %s225_s11 = sshll.u32 %s1006_s10, 4  ;;  %s226_s11 = int_to_ptr.vmem [resolvable:$true] %s225_s11 }
  0x19   : > { %p641_p13 = scmp.ge.s32.totalorder %s996_s23, 2  ;;  %p680_p0 = pneg %p1111_p12 }
  0x1a   : > { %p699_p1 = scmp.lt.s32.totalorder %s996_s23, 2  ;;  %s37_s13 = sadd.s32 1, %s992_s22 }
  0x1b   : > { %s223_s8 = sshll.u32 %s1262_s2, 4  ;;  %p681_p2 = pnand %p680_p0, %p63_p3  ;;  %s224_s8 = int_to_ptr.hbm [resolvable:$true] %s223_s8 }
  0x1c   : > { %p1123_p4 = pnand %p699_p1, %p1088_p5  ;;  %p38_p6 = scmp.ge.s32.totalorder %s37_s13, 2 }
  0x1d   : > { %683 = dma.hbm_to_vmem [thread:$0]  (!%p681_p2), %s224_s8, 32, %s226_s11, [#allocation6]  }
  0x1e   : > { %s243_s14 = sand.u32 1, %s984_s20   ;;  %s1275_s13 = smov (%p38_p6, %s37_s13), 0 }
  0x1f   : > { %1265 = sst [smem:[#allocation19_spill]] %s1275_s13  ;;  %s642_s15 = sshll.u32 %s243_s14, 3 }
  0x20   : > { %s44_s16 = ssub.s32 %s992_s22, %s1275_s13  ;;  %s664_s17 = sshll.u32 %s992_s22, 3 }
  0x21   : > { %p47_p10 = scmp.eq.s32.totalorder %s44_s16, 0  ;;  %s1266_s0 = sld [smem:[#allocation20_spill]] }
  0x22   : > { %s247_s7 = scalar_lea.vmem [#allocation2], %s642_s15  ;;  %s244_s11 = scalar_lea.sflag [#allocation3], %s243_s14 }
  0x23   : > { %s256_s10 = sshll.u32 %s247_s7, 4  ;;  %s1007_s30 = smov 32   ;;  %s257_s10 = int_to_ptr.vmem [resolvable:$true] %s256_s10 }
  0x24   : > { %s1140_s2 = scalar_select %p47_p10, %s984_s20, %s49_s26  }
  0x25   : > { %s1008_s18 = smov 2   ;;  %s276_s25 = scalar_lea.hbm %s1244_s1, %s664_s17 }
  0x26   : > { %s270_s6 = scalar_lea.vmem [#allocation5], %s642_s15  ;;  %s277_s22 = sshll.u32 %s276_s25, 4  ;;  %s278_s22 = int_to_ptr.hbm [resolvable:$true] %s277_s22 }
  0x27   : > { %s253_s27 = scalar_lea.hbm %s1266_s0, %s664_s17  ;;  %s279_s0 = sshll.u32 %s270_s6, 4  ;;  %s280_s0 = int_to_ptr.vmem [resolvable:$true] %s279_s0 }
  0x28   : > { %s254_s8 = sshll.u32 %s253_s27, 4  ;;  %s266_s26 = sand.u32 1, %s996_s23   ;;  %s255_s8 = int_to_ptr.hbm [resolvable:$true] %s254_s8 }
  0x29   : > { %687 = dma.hbm_to_vmem [thread:$0]  (!%p1123_p4), %s255_s8, 128, %s257_s10, %s244_s11, %s1007_s30, %s1007_s30, %s1008_s18  }
  0x2a   : > { %s267_s7 = scalar_lea.sflag [#allocation6], %s266_s26  ;;  %291 = sbr.rel (%p1111_p12) target bundleno = 450 (0x1c2), region = 36 }
  0x2b   : > { %690 = dma.hbm_to_vmem [thread:$0]  (!%p1123_p4), %s278_s22, 128, %s280_s0, %s267_s7, %s1007_s30, %s1007_s30, %s1008_s18  }
  0x2c   : > { %s1153_s14 = sand.u32 (!%p1111_p12), 1, %s980_s19  }
  0x2d   : > { %s1156_s13 = sshll.u32 (!%p1111_p12), %s1153_s14, 3  ;;  %s294_s15 = scalar_lea.sflag (!%p1111_p12), [#allocation3], %s1153_s14 }
  0x2e   : > { %s297_s17 = scalar_lea.vmem (!%p1111_p12), [#allocation2], %s1156_s13 }
  0x2f   : > { %955 = dma.done.wait (%p1094_p7), %s294_s15, 128  }
  0x30   : > { %957 = vsyncadd (%p1094_p7), %s294_s15, 4294967168  ;;  %s303_s0 = sand.u32 1, %s1077_s24   ;;  %s307_s22 = scalar_lea.vmem [#allocation5], %s1156_s13 }
  0x31   : > { %s304_s18 = scalar_lea.sflag [#allocation6], %s303_s0 }
  0x32   : > { %959 = dma.done.wait (%p1094_p7), %s304_s18, 128  }
  0x33   : > { %961 = vsyncadd (%p1094_p7), %s304_s18, 4294967168 }
  0x34   : > { %963 = dma.done.wait (%p63_p3), [#allocation6], 32  }
  0x35   : > { %965 = vsyncadd (%p63_p3), [#allocation6], 4294967264  ;;  %v362_v0 = vld [vmem:[#allocation7] sm:$0x3]  ;;  %s1009_s12 = smov 1   ;;  %s346_s27 = scalar_lea.vmem [#allocation8], %s1156_s13 }
  0x36   : > { %v363_v1 = vld [vmem:[%s1246_s3] sm:$0x3]  ;;  %s353_s28 = scalar_lea.vmem [#allocation9], %s1156_s13  ;;  %s998_s10 = smov 0  }
  0x37   : > { %364 = vrot.lane.b32.xlu0 %v363_v1, %s1009_s12 }
  0xa9   : > { %v365_v2 = vpop.permute.xlu0 %364 }
  0xaa   : > { %v366_v3 = vsub.f32 0.0, %v365_v2 }
  0xab LB: >> { %s654_s24 = sshll.u32 %s1000_s10, 1  ;;  %s1010_s11 = smov 127   ;;  %s1000_s10 = sphi %s998_s10, %s372_s10  }
  0xac   : >> { %s374_s8 = scalar_lea.vmem %s297_s17, %s654_s24 [#allocation2]  ;;  %s1011_s16 = smov 1  }
  0xad   : >> { %v375_v4 = vld [vmem:[%s374_s8] sm:$0x3]  ;;  %s385_s25 = scalar_lea.vmem %s346_s27, %s654_s24 [#allocation8]  ;;  %s372_s10 = sadd.s32 1, %s1000_s10  }
  0xae   : >> { %376 = vrot.lane.b32.xlu0 %v375_v4, %s1010_s11  ;;  %v380_v6 = vmul.f32 %v375_v4, %v362_v0  ;;  %p369_p3 = scmp.ge.s32.totalorder %s372_s10, 4  }
  0xaf   : > { %s1002_s6 = smov (%p369_p3), 0  }
  0xb6   : >> { %378 = vrot.lane.b32.xlu0 %v375_v4, %s1011_s16 }
 0x120   : >> { %v377_v5 = vpop.permute.xlu0 %376 }
 0x121   : >> { %v381_v7 = vmul.f32 %v377_v5, %v363_v1 }
 0x123   : >> { %v382_v9 = vadd.f32 %v381_v7, %v380_v6 }
 0x128   : >> { %v379_v8 = vpop.permute.xlu0 %378 }
 0x129   : >> { %v383_v10 = vmul.f32 %v379_v8, %v366_v3  ;;  %371 = sbr.rel (!%p369_p3) target bundleno = 171 (0xab), region = 137 }
 0x12b   : >> { %v384_v11 = vadd.f32 %v383_v10, %v382_v9 }
 0x12d   : >> { %386 = vst [vmem:[%s385_s25] sm:$0x3] %v384_v11 }
 0x12e LB: >> { %s655_s26 = sshll.u32 %s1004_s6, 1  ;;  %s1012_s15 = smov 127   ;;  %s1004_s6 = sphi %s1002_s6, %s392_s6  }
 0x12f   : >> { %s394_s7 = scalar_lea.vmem %s307_s22, %s655_s26 [#allocation5]  ;;  %s1013_s0 = smov 1  }
 0x130   : >> { %v395_v12 = vld [vmem:[%s394_s7] sm:$0x3]  ;;  %s405_s17 = scalar_lea.vmem %s353_s28, %s655_s26 [#allocation9]  ;;  %s392_s6 = sadd.s32 1, %s1004_s6  }
 0x131   : >> { %396 = vrot.lane.b32.xlu0 %v395_v12, %s1012_s15  ;;  %v400_v14 = vmul.f32 %v395_v12, %v362_v0  ;;  %p389_p5 = scmp.ge.s32.totalorder %s392_s6, 4  }
 0x132   : > { %s666_s18 = sshll.u32 (%p389_p5), %s988_s21, 3  ;;  %s426_s10 = sshll.u32 (%p389_p5), %s346_s27, 4  ;;  %s427_s10 = int_to_ptr.vmem [resolvable:$true] %s426_s10 }
 0x133   : > { %s425_s12 = scalar_lea.hbm (%p389_p5), %s1247_s4, %s666_s18  ;;  %s408_s8 = scalar_lea.sflag (%p389_p5), [#allocation4], %s1153_s14 }
 0x134   : > { %s428_s24 = sshll.u32 (%p389_p5), %s425_s12, 4  ;;  %s886_s21 = scalar_lea.hbm (%p389_p5), %s1247_s4, 16  ;;  %s429_s24 = int_to_ptr.hbm [resolvable:$true] %s428_s24 }
 0x135   : > { %s880_s11 = sshra.s32 (%p389_p5), %s429_s24, 4  ;;  %s881_s11 = int_to_ptr.hbm [resolvable:$true] %s880_s11 }
 0x136   : > { %s882_s16 = scalar_lea.hbm (%p389_p5), %s881_s11, 8  ;;  %p887_p0 = scmp.lt.s32.totalorder (%p389_p5), %s881_s11, %s1247_s4 }
 0x137   : > { %p883_p7 = scmp.ne.s32.totalorder (%p389_p5), %s881_s11, %s882_s16  ;;  %p888_p1 = scmp.lt.s32.totalorder (%p389_p5), %s886_s21, %s882_s16 }
 0x139   : >> { %398 = vrot.lane.b32.xlu0 %v395_v12, %s1013_s0  ;;  %p884_p11 = pnand (%p389_p5), %p883_p7, %p1098_p8  ;;  %p889_p2 = por (%p389_p5), %p888_p1, %p887_p0 }
 0x13b   : > { %p885_p12 = pneg (%p389_p5), %p884_p11 }
 0x13d   : > { %p890_p4 = pnand (%p389_p5), %p889_p2, %p885_p12 }
 0x1a3   : >> { %v397_v13 = vpop.permute.xlu0 %396 }
 0x1a4   : >> { %v401_v15 = vmul.f32 %v397_v13, %v363_v1 }
 0x1a6   : >> { %v402_v17 = vadd.f32 %v401_v15, %v400_v14 }
 0x1ab   : >> { %v399_v16 = vpop.permute.xlu0 %398 }
 0x1ac   : >> { %v403_v18 = vmul.f32 %v399_v16, %v366_v3  ;;  %391 = sbr.rel (!%p389_p5) target bundleno = 302 (0x12e), region = 148 }
 0x1ae   : >> { %v404_v19 = vadd.f32 %v403_v18, %v402_v17 }
 0x1b0   : >> { %406 = vst [vmem:[%s405_s17] sm:$0x3] %v404_v19 }
 0x1b1   : > { %893 = shalt.err (!%p890_p4)
}
 0x1b2   : > { %s1014_s27 = smov 32   ;;  %s1015_s7 = smov 2  }
 0x1b3   : > { %676 = dma.vmem_to_hbm [thread:$0]  (%p1098_p8), %s427_s10, 128, %s429_s24, %s408_s8, %s1014_s27, %s1014_s27, %s1015_s7  }
 0x1b4   : > { %s443_s17 = scalar_lea.hbm %s1248_s5, %s666_s18  ;;  %s444_s30 = sshll.u32 %s353_s28, 4  ;;  %s445_s30 = int_to_ptr.vmem [resolvable:$true] %s444_s30 }
 0x1b5   : > { %s446_s9 = sshll.u32 %s443_s17, 4  ;;  %s413_s12 = scalar_lea.sflag [#allocation10], %s1153_s14  ;;  %s447_s9 = int_to_ptr.hbm [resolvable:$true] %s446_s9 }
 0x1b6   : > { %s908_s11 = sshra.s32 %s447_s9, 4  ;;  %s914_s10 = scalar_lea.hbm %s1248_s5, 16  ;;  %s909_s11 = int_to_ptr.hbm [resolvable:$true] %s908_s11 }
 0x1b7   : > { %s910_s16 = scalar_lea.hbm %s909_s11, 8  ;;  %p915_p5 = scmp.lt.s32.totalorder %s909_s11, %s1248_s5 }
 0x1b8   : > { %p911_p6 = scmp.ne.s32.totalorder %s909_s11, %s910_s16  ;;  %p916_p7 = scmp.lt.s32.totalorder %s914_s10, %s910_s16 }
 0x1ba   : > { %p912_p10 = pnand %p911_p6, %p1098_p8  ;;  %p917_p11 = por %p916_p7, %p915_p5 }
 0x1bc   : > { %p913_p3 = pneg %p912_p10 }
 0x1be   : > { %p918_p12 = pnand %p917_p11, %p913_p3 }
 0x1c0   : > { %921 = shalt.err (!%p918_p12)
}
 0x1c1   : > { %677 = dma.vmem_to_hbm [thread:$0]  (%p1098_p8), %s445_s30, 128, %s447_s9, %s413_s12, %s1014_s27, %s1014_s27, %s1015_s7  }
 0x1c2 PF: > { %s1267_s14 = sld [smem:[#allocation16_spill]]  ;;  %p692_p0 = pnand %p641_p13, %p1102_p9 }
 0x1c4   : > { %p693_p1 = pneg %p692_p0 }
 0x1c8   : > { %s461_s28 = sand.u32 1, %s1267_s14  }
 0x1c9   : > { %s462_s18 = scalar_lea.sflag [#allocation4], %s461_s28 }
 0x1ca   : > { %967 = dma.done.wait (%p693_p1), %s462_s18, 128  }
 0x1cb   : > { %969 = vsyncadd (%p693_p1), %s462_s18, 4294967168  ;;  %s472_s21 = scalar_lea.sflag [#allocation10], %s461_s28 }
 0x1cc   : > { %971 = dma.done.wait (%p693_p1), %s472_s21, 128  }
 0x1cd   : > { %973 = vsyncadd (%p693_p1), %s472_s21, 4294967168  ;;  %s28_s23 = sadd.s32 1, %s996_s23   ;;  %s1269_s21 = sld [smem:[#allocation17_spill]] }
 0x1ce   : > { %p25_p2 = scmp.ge.s32.totalorder %s28_s23, 4   ;;  %s1270_s22 = sld [smem:[#allocation19_spill]] }
 0x1cf   : > { %s1271_s18 = smov %s980_s19  ;;  %s1272_s19 = smov %s984_s20 }
 0x1d0   : > { %s1273_s20 = smov %s1140_s2  ;;  %27 = sbr.rel (!%p25_p2) target bundleno = 13 (0xd), region = 159 }
 0x1d5   :  { %478 = vsyncpa [#allocation3], 1 }
 0x1d6   :  { %480 = vsyncpa [#allocation3 + $0x1], 1 }
 0x1d7   :  { %481 = vsyncpa [#allocation6], 1 }
 0x1d8   :  { %483 = vsyncpa [#allocation6 + $0x1], 1 }
 0x1d9   :  { %484 = vsyncpa [#allocation4], 1 }
 0x1da   :  { %486 = vsyncpa [#allocation4 + $0x1], 1 }
 0x1db   :  { %487 = vsyncpa [#allocation10], 1 }
 0x1dc   :  { %489 = vsyncpa [#allocation10 + $0x1], 1 }

</bundles_post_ra>
